<compile_context>
chip_gen: v7x
topology: tpu7x:2x2x1
jax: 0.10.0
libtpu: 0.0.40
codegen_flags: <defaults>
</compile_context>

<pallas_src>
import jax
import jax.numpy as jnp
from jax.experimental import pallas as pl
from jax.experimental.pallas import tpu as pltpu


def bias_add_kernel(bias_ref, x_ref, o_ref):
    # bias_ref: (1, tf) block broadcast over the sublane (row) dim.
    # x_ref / o_ref: (tb, tf) blocks.
    o_ref[...] = x_ref[...] + bias_ref[...]


# ---------------------------------------------------------------------------
# Heuristics / constants
# ---------------------------------------------------------------------------
_PALLAS_MIN_BYTES = 1 << 20        # below this, an XLA fusion beats any custom kernel
_MIN_TILE_BYTES = 256 * 1024       # don't split batch into tiles smaller than this
_MAX_TILE_BYTES = 8 * 1024 * 1024  # measured f32-add roofline saturates (~86%) by ~4 MiB
_MIN_GRID_STEPS = 4                # >= 2 steps per TensorCore on v7x + in/out DMA overlap
_TARGET_FOLD_LANES = 2048          # fold rows into the lane dim up to this width


def _vmem_capacity_bytes():
    """Physical VMEM per TensorCore; conservative (v7x, 64 MiB) fallback."""
    try:
        info = pltpu.get_tpu_info()
        for name in ("vmem_capacity_bytes", "vmem_bytes", "vmem_size_bytes"):
            cap = getattr(info, name, None)
            if cap:
                return int(cap)
    except Exception:
        pass
    return 64 * 1024 * 1024


def _sublane_multiple(dtype):
    """Minimum sublane block multiple for a dtype (sub-32-bit dtypes pack sublanes)."""
    bits = jnp.dtype(dtype).itemsize * 8
    if bits >= 32:
        return 8
    if bits == 16:
        return 16
    return 32


def _pick_fold(B, F, target_lanes):
    """Largest k>1 with B % k == 0, (k*F) % 128 == 0 and k*F <= target_lanes."""
    if F <= 0 or F >= target_lanes:
        return 1
    for k in range(target_lanes // F, 1, -1):
        if B % k == 0 and (k * F) % 128 == 0:
            return k
    return 1


def _choose_tiles(b_eff, f_eff, itemsize, sub, per_buf_cap):
    """Pick (tb, tf): lane-dense, VMEM-legal, with enough grid steps for overlap."""
    lane = 128
    row_bytes = f_eff * itemsize

    # Very wide feature dim: even `sub` rows over full F exceed the budget ->
    # tile the lane dim (multiple of 128) and stream with minimal rows.
    if sub * row_bytes > per_buf_cap and f_eff > lane:
        tf = max(lane, (per_buf_cap // (sub * itemsize)) // lane * lane)
        tb = b_eff if b_eff <= sub else sub
        return tb, tf

    tf = f_eff
    rows_cap = max(sub, per_buf_cap // max(1, row_bytes))
    tb = min(b_eff, rows_cap)

    # Guarantee multiple batch tiles (writeback of tile i-1 overlaps load of
    # tile i+1; v7x megacore gets >= 2 tiles per core) as long as tiles stay
    # above a minimum useful size.
    if b_eff > sub:
        min_rows = max(sub, -(-_MIN_TILE_BYTES // max(1, row_bytes)))
        want_tb = max(min_rows, b_eff // _MIN_GRID_STEPS)
        tb = min(tb, want_tb)

    if tb < b_eff:
        tb = max(sub, (tb // sub) * sub)
    return min(tb, b_eff), tf


def bias_supervised_forward(x, bias, *, force_pallas=False, donate_x=False):
    """out = bias + x, with bias of shape (F,) broadcast over the leading dim of x."""
    B, F = x.shape
    itemsize = jnp.dtype(x.dtype).itemsize

    # Tiny-problem fast path: let XLA fuse it (a Pallas call only loses here).
    if not force_pallas and B * F * itemsize < _PALLAS_MIN_BYTES:
        return bias.astype(x.dtype) + x

    # ---- Lane folding --------------------------------------------------------
    # (B, F) -> (B//k, k*F) with bias tiled k times preserves `bias + x`
    # semantics (row-major reshape concatenates k consecutive old rows per new
    # row) and turns narrow / masked stores into full-width lane-dense `vst`.
    x_eff, bias_eff = x, bias
    b_eff, f_eff = B, F
    folded = False
    if F % 128 != 0 or F < 512:
        k = _pick_fold(B, F, _TARGET_FOLD_LANES)
        if k > 1:
            b_eff, f_eff = B // k, F * k
            x_eff = x.reshape(b_eff, f_eff)
            bias_eff = jnp.tile(bias, k)
            folded = True

    # NOTE: bias is cast to x.dtype before the add (matches the all-f32 module;
    # differs from PyTorch type-promotion only for mixed-precision inputs).
    bias2d = bias_eff.reshape(1, f_eff).astype(x.dtype)

    # ---- Tile selection (generation-aware) -----------------------------------
    vmem_cap = _vmem_capacity_bytes()
    # Per-buffer cap ~ VMEM/10 (x and out each double-buffered -> ~40% of VMEM
    # live), never above 8 MiB (diminishing returns past ~4 MiB f32 tiles).
    per_buf_cap = min(_MAX_TILE_BYTES, max(512 * 1024, vmem_cap // 10))
    sub = _sublane_multiple(x.dtype)
    tb, tf = _choose_tiles(b_eff, f_eff, itemsize, sub, per_buf_cap)

    grid = (pl.cdiv(b_eff, tb), pl.cdiv(f_eff, tf))

    # Scoped-VMEM limit: 2x double-buffered x + out tiles + bias + headroom,
    # always below physical VMEM (important on v5e whose scoped default is
    # 16 MiB, and on v7x whose physical VMEM is only 64 MiB per TC).
    tile_bytes = tb * tf * itemsize
    live = 4 * tile_bytes + 2 * tf * itemsize + (1 << 20)
    vmem_limit = int(min(max(32 << 20, 2 * live), max(vmem_cap - (4 << 20), live)))

    cost = pl.CostEstimate(
        flops=b_eff * f_eff,
        transcendentals=0,
        bytes_accessed=2 * b_eff * f_eff * itemsize + f_eff * itemsize,
    )

    out = pl.pallas_call(
        bias_add_kernel,
        out_shape=jax.ShapeDtypeStruct((b_eff, f_eff), x.dtype),
        grid_spec=pltpu.PrefetchScalarGridSpec(
            num_scalar_prefetch=0,
            grid=grid,
            in_specs=[
                pl.BlockSpec((1, tf), lambda i, j: (0, j)),    # bias: lane-tiled, batch-resident
                pl.BlockSpec((tb, tf), lambda i, j: (i, j)),   # x: streamed over batch & lanes
            ],
            out_specs=pl.BlockSpec((tb, tf), lambda i, j: (i, j)),
        ),
        compiler_params=pltpu.CompilerParams(
            # Both axes fully independent -> shard across TensorCores (v7x megacore).
            dimension_semantics=("parallel", "parallel"),
            vmem_limit_bytes=vmem_limit,
        ),
        cost_estimate=cost,
        input_output_aliases=({1: 0} if donate_x else {}),
    )(bias2d, x_eff)

    if folded:
        out = out.reshape(B, F)
    return out


if __name__ == "__main__":
    # Module config: Bias_supervised(num_features=32, offset=0.5)
    num_features = 32
    offset = 0.5
    batch = 2

    # Deterministic parameter init (matches offset * torch.ones(num_features))
    bias = offset * jnp.ones((num_features,), dtype=jnp.float32)

    # Deterministic input
    key = jax.random.PRNGKey(0)
    x = jax.random.normal(key, (batch, num_features), dtype=jnp.float32)

    # force_pallas=True so the Pallas kernel itself runs even at this tiny size
    # (production use takes the XLA-fusion fast path below 1 MiB).
    out = jax.block_until_ready(bias_supervised_forward(x, bias, force_pallas=True))
    ref = bias + x
    assert out.shape == x.shape and out.dtype == x.dtype
    assert jnp.allclose(out, ref, atol=1e-6), "mismatch vs reference (tiny)"

    # Larger shape: exercises lane folding (32 -> 2048 lanes) and a multi-step grid.
    xb = jax.random.normal(jax.random.PRNGKey(1), (4096, 32), dtype=jnp.float32)
    outb = jax.block_until_ready(bias_supervised_forward(xb, bias, force_pallas=True))
    assert jnp.allclose(outb, bias + xb, atol=1e-6), "mismatch vs reference (large)"

    # Non-foldable, non-128-aligned shape: exercises the masked-store fallback.
    bias_odd = 0.25 * jnp.ones((100,), dtype=jnp.float32)
    xo = jax.random.normal(jax.random.PRNGKey(2), (10, 100), dtype=jnp.float32)
    outo = jax.block_until_ready(bias_supervised_forward(xo, bias_odd, force_pallas=True))
    assert jnp.allclose(outo, bias_odd + xo, atol=1e-6), "mismatch vs reference (odd)"

    print("KERNEL_OK")
</pallas_src>

<mosaic_0001>
module attributes {stable_mosaic.version = 11 : i64} {
  func.func @bias_add_kernel(%arg0: i32, %arg1: i32, %arg2: memref<1x32xf32, #tpu.memory_space<vmem>>, %arg3: memref<2x32xf32, #tpu.memory_space<vmem>>, %arg4: memref<2x32xf32, #tpu.memory_space<vmem>>) attributes {dimension_semantics = [#tpu.dimension_semantics<parallel>, #tpu.dimension_semantics<parallel>], iteration_bounds = array<i64: 1, 1>, scalar_prefetch = 0 : i64, scratch_operands = 0 : i64, tpu.core_type = #tpu.core_type<tc>, window_params = [{transform_indices = @transform_0, window_bounds = array<i64: 1, 32>}, {transform_indices = @transform_1, window_bounds = array<i64: 2, 32>}, {transform_indices = @transform_2, window_bounds = array<i64: 2, 32>}]} {
    %c0 = arith.constant 0 : index
    %c0_0 = arith.constant 0 : index
    %0 = vector.load %arg3[%c0, %c0_0] : memref<2x32xf32, #tpu.memory_space<vmem>>, vector<2x32xf32>
    %c0_1 = arith.constant 0 : index
    %c0_2 = arith.constant 0 : index
    %1 = vector.load %arg2[%c0_1, %c0_2] : memref<1x32xf32, #tpu.memory_space<vmem>>, vector<1x32xf32>
    %2 = vector.broadcast %1 : vector<1x32xf32> to vector<2x32xf32>
    %3 = arith.addf %0, %2 : vector<2x32xf32>
    %c0_3 = arith.constant 0 : index
    %c0_4 = arith.constant 0 : index
    %4 = vector.load %arg4[%c0_3, %c0_4] : memref<2x32xf32, #tpu.memory_space<vmem>>, vector<2x32xf32>
    tpu.vector_store %arg4[%c0_3, %c0_4], %3 {strides = array<i32>} : memref<2x32xf32, #tpu.memory_space<vmem>>, vector<2x32xf32>,
    return
  }
  func.func @transform_0(%arg0: i32, %arg1: i32) -> (i32, i32) {
    %c0_i32 = arith.constant 0 : i32
    %c0_i32_0 = arith.constant 0 : i32
    return %c0_i32, %arg1 : i32, i32
  }
  func.func @transform_1(%arg0: i32, %arg1: i32) -> (i32, i32) {
    %c0_i32 = arith.constant 0 : i32
    return %arg0, %arg1 : i32, i32
  }
  func.func @transform_2(%arg0: i32, %arg1: i32) -> (i32, i32) {
    %c0_i32 = arith.constant 0 : i32
    return %arg0, %arg1 : i32, i32
  }
}

</mosaic_0001>

<bundles_post_ra>
// kernel: tpu_custom_call.1
= control target key start
LH: loop header
LB: loop body
LE: loop exit
PB: predicated region body
PF: predicated region fallthrough
CT: control target
= control target key end

     0   :  { %7 = vsyncpa [#allocation3], 0  ;;  %s145_s0 = inlined_call_operand.hbm [shape: f32[1,32], index: 0, kind: input, shape index: {}]   ;;  %s146_s1 = inlined_call_operand.vmem [shape: f32[2,32], index: 1, kind: input, shape index: {}]   ;;  %s147_s2 = inlined_call_operand.hbm [shape: f32[2,32], index: 2, kind: output, shape index: {}]  }
   0x1   :  { %8 = vsyncpa [#allocation4], 0  ;;  %s101_s9 = smov [#allocation2]   ;;  %s53_s13 = scalar_lea.hbm %s145_s0, 16 }
   0x2   :  { %s15_s10 = sshll.u32 %s101_s9, 4  ;;  %p54_p0 = scmp.ne.s32.totalorder %s145_s0, %s53_s13  ;;  %s16_s10 = int_to_ptr.vmem [resolvable:$true] %s15_s10 }
   0x3   :  { %p57_p1 = scmp.lt.u32.totalorder %s53_s13, %s145_s0 }
   0x5   :  { %p59_p2 = pnand %p57_p1, %p54_p0 }
   0x7   :  { %62 = shalt.err (!%p59_p2)
}
   0x8   :  { %s63_s18 = scalar_lea.vmem %s16_s10, 16  ;;  %s67_s19 = scalar_lea.vmem %s16_s10, 32 }
   0x9   :  { %p64_p3 = scmp.ne.s32.totalorder %s16_s10, %s63_s18  ;;  %p68_p4 = scmp.lt.s32.totalorder %s16_s10, %s16_s10 }
   0xa   :  { %p69_p5 = scmp.lt.s32.totalorder %s67_s19, %s63_s18 }
   0xc   :  { %p70_p6 = por %p69_p5, %p68_p4 }
   0xe   :  { %p71_p7 = pnand %p70_p6, %p64_p3 }
  0x10   :  { %74 = shalt.err (!%p71_p7)
}
  0x11   :  { %18 = dma.hbm_to_vmem [thread:$0]  %s145_s0, 16, %s16_s10, [#allocation3]  }
  0x12   :  { %97 = dma.done.wait [#allocation3], 16  }
  0x13   :  { %98 = vsyncadd [#allocation3], 4294967280  ;;  %s102_s22 = smov [#allocation5]   ;;  %v24_v0 = vld [vmem:[%s146_s1] sm:$0x3]  ;;  %vm33_vm0 = vcmask 254976  }
  0x14   :  { %s41_s23 = sshll.u32 %s102_s22, 4  ;;  %v50_v1 = vld [vmem:[#allocation2] ss:$0 sm:$0xff]  ;;  %s42_s23 = int_to_ptr.vmem [resolvable:$true] %s41_s23 }
  0x15   :  { %v32_v2 = vadd.f32 %v50_v1, %v24_v0  ;;  %s75_s26 = scalar_lea.vmem %s42_s23, 32  ;;  %p80_p9 = scmp.lt.s32.totalorder %s42_s23, %s42_s23 }
  0x16   :  { %p76_p8 = scmp.ne.s32.totalorder %s42_s23, %s75_s26  ;;  %p81_p10 = scmp.lt.s32.totalorder %s75_s26, %s75_s26 }
  0x17   :  { %34 = vst.msk [vmem:[#allocation5] sm:$0x3] %vm33_vm0, %v32_v2 }
  0x18   :  { %p82_p11 = por %p81_p10, %p80_p9 }
  0x1a   :  { %p83_p12 = pnand %p82_p11, %p76_p8 }
  0x1c   :  { %86 = shalt.err (!%p83_p12)
}
  0x1d   :  { %s87_s28 = scalar_lea.hbm %s147_s2, 32 }
  0x1e   :  { %p88_p13 = scmp.ne.s32.totalorder %s147_s2, %s87_s28  ;;  %p91_p0 = scmp.lt.u32.totalorder %s87_s28, %s147_s2 }
  0x20   :  { %p93_p1 = pnand %p91_p0, %p88_p13 }
  0x22   :  { %96 = shalt.err (!%p93_p1)
}
  0x23   :  { %44 = dma.vmem_to_hbm [thread:$0]  %s42_s23, 32, %s147_s2, [#allocation4]  }
  0x24   :  { %99 = dma.done.wait [#allocation4], 32  }
  0x25   :  { %100 = vsyncadd [#allocation4], 4294967264 }
  0x26   :  { %48 = vsyncpa [#allocation3], 1 }
  0x27   :  { %49 = vsyncpa [#allocation4], 1 }

</bundles_post_ra>
